<compile_context>
chip_gen: v6e
topology: v6e:2x2x1
jax: 0.10.0
libtpu: 0.0.40
codegen_flags: <defaults>
</compile_context>

<pallas_src>
import math

import jax
import jax.numpy as jnp
from jax.experimental import pallas as pl
from jax.experimental.pallas import tpu as pltpu


_TOTAL_VMEM_BUDGET = 24 << 20   # target total footprint incl. double buffering
_VMEM_LIMIT_BYTES = 32 << 20    # explicit scoped-VMEM limit (raises v5e's 16 MiB default)


def _pe_add_kernel(x_ref, pe_ref, o_ref):
    # x_ref/o_ref: (bb, ts, d_model); pe_ref: (ts, d_model) — broadcast over batch rows
    o_ref[...] = (x_ref[...] + pe_ref[...][None, :, :]).astype(o_ref.dtype)


def _pe_add_flat_kernel(x_ref, pe_ref, o_ref):
    # x_ref/o_ref: (bb, ft); pe_ref: (1, ft) — lane-dense flattened (seq*d_model) axis
    o_ref[...] = (x_ref[...] + pe_ref[...]).astype(o_ref.dtype)


def build_pe_table(d_model, max_seq_len, dtype=jnp.float32):
    """Sinusoidal PE table matching the reference module (sin in both slots)."""
    assert d_model % 2 == 0, "d_model must be even"
    pos = jnp.arange(max_seq_len, dtype=jnp.float32)[:, None]        # (L, 1)
    two_i = jnp.arange(0, d_model, 2, dtype=jnp.float32)[None, :]    # (1, D/2)
    angle = pos / jnp.power(10000.0, two_i / d_model)                # (L, D/2)
    pe = jnp.zeros((max_seq_len, d_model), jnp.float32)
    pe = pe.at[:, 0::2].set(jnp.sin(angle))
    pe = pe.at[:, 1::2].set(jnp.sin(angle))   # reference uses sin here too (not cos)
    return pe.astype(dtype)


def _sublane_quantum(itemsize):
    # sub-32-bit dtypes pack along sublanes: 8 rows (f32), 16 (bf16), 32 (int8/fp8)
    return {4: 8, 2: 16, 1: 32}.get(itemsize, 8)


def _x_block_budget(bb, total_budget):
    # footprint ≈ 2*(x + out) + 2*pe ≈ (4 + 2/bb) * x_block   (pe block ≈ x block / bb)
    return int(total_budget / (4.0 + 2.0 / max(bb, 1)))


def _pick_tiles_3d(batch, seq, d_model, itemsize, sub, total_budget):
    """(bb, ts) for blocks of shape (bb, ts, d_model)."""
    row = d_model * itemsize
    bb = batch
    ts = _x_block_budget(bb, total_budget) // (bb * row)
    if ts < sub:                       # full batch too fat: shrink the batch block
        bb = max(1, min(batch, _x_block_budget(1, total_budget) // (sub * row)))
        ts = max(sub, _x_block_budget(bb, total_budget) // (bb * row))
    if ts >= seq:
        ts = seq                       # full extent — no alignment constraint
    else:
        ts = max(sub, (ts // sub) * sub)
    return bb, ts


def _pick_tiles_flat(batch, flat, d_model, itemsize, sub, total_budget):
    """(bb, ft) for blocks of shape (bb, ft) over a (batch, seq*d_model) view."""
    unit = (d_model * 128) // math.gcd(d_model, 128)   # lcm(d_model, 128): PE-aligned, lane-dense
    bb = batch
    ft = _x_block_budget(bb, total_budget) // (bb * itemsize)
    if ft < unit and batch > sub:
        # shrink the batch block (must stay a multiple of the sublane quantum)
        bb = min(batch, max(sub, (_x_block_budget(sub, total_budget)
                                  // (unit * itemsize)) // sub * sub))
        ft = _x_block_budget(bb, total_budget) // (bb * itemsize)
    if ft >= flat:
        ft = flat                      # full extent
    else:
        ft = max(unit, (ft // unit) * unit)
    return bb, ft


def positional_encoding_forward(x, pe_table):
    """x: (batch, seq, d_model) floats. pe_table: (max_seq_len, d_model)."""
    batch, seq, d_model = x.shape
    assert pe_table.shape[0] >= seq and pe_table.shape[1] == d_model
    # Cast PE to x.dtype: no implicit f32 promote/downcast, half-width stream for bf16.
    pe = pe_table[:seq].astype(x.dtype)

    itemsize = x.dtype.itemsize
    sub = _sublane_quantum(itemsize)
    cp = pltpu.CompilerParams(
        dimension_semantics=("parallel", "parallel"),
        vmem_limit_bytes=_VMEM_LIMIT_BYTES)

    if d_model % 128 == 0:
        # Already lane-dense: keep 3-D layout, block several batch rows per step.
        bb, ts = _pick_tiles_3d(batch, seq, d_model, itemsize, sub, _TOTAL_VMEM_BUDGET)
        grid = (pl.cdiv(seq, ts), pl.cdiv(batch, bb))     # seq outer, batch inner
        return pl.pallas_call(
            _pe_add_kernel,
            out_shape=jax.ShapeDtypeStruct((batch, seq, d_model), x.dtype),
            grid_spec=pltpu.PrefetchScalarGridSpec(
                num_scalar_prefetch=0,
                grid=grid,
                in_specs=[
                    pl.BlockSpec((bb, ts, d_model), lambda s, b: (b, s, 0)),
                    # constant over the inner batch axis -> PE tile stays VMEM-resident
                    pl.BlockSpec((ts, d_model), lambda s, b: (s, 0)),
                ],
                out_specs=pl.BlockSpec((bb, ts, d_model), lambda s, b: (b, s, 0)),
            ),
            compiler_params=cp,
        )(x, pe)

    # d_model not a multiple of 128: flatten (seq, d_model) into one lane-dense axis.
    flat = seq * d_model
    bb, ft = _pick_tiles_flat(batch, flat, d_model, itemsize, sub, _TOTAL_VMEM_BUDGET)
    x2 = x.reshape(batch, flat)
    pe2 = pe.reshape(1, flat)
    grid = (pl.cdiv(flat, ft), pl.cdiv(batch, bb))        # flat outer, batch inner
    out = pl.pallas_call(
        _pe_add_flat_kernel,
        out_shape=jax.ShapeDtypeStruct((batch, flat), x.dtype),
        grid_spec=pltpu.PrefetchScalarGridSpec(
            num_scalar_prefetch=0,
            grid=grid,
            in_specs=[
                pl.BlockSpec((bb, ft), lambda f, b: (b, f)),
                # constant over the inner batch axis -> PE tile stays VMEM-resident
                pl.BlockSpec((1, ft), lambda f, b: (0, f)),
            ],
            out_specs=pl.BlockSpec((bb, ft), lambda f, b: (b, f)),
        ),
        compiler_params=cp,
    )(x2, pe2)
    return out.reshape(batch, seq, d_model)


if __name__ == "__main__":
    d_model = 32
    max_seq_len = 16
    batch, seq = 2, 8

    key = jax.random.PRNGKey(0)
    x = jax.random.normal(key, (batch, seq, d_model), dtype=jnp.float32)

    pe_table = build_pe_table(d_model, max_seq_len, dtype=x.dtype)

    out = positional_encoding_forward(x, pe_table)
    out = jax.block_until_ready(out)

    # reference in plain JAX
    ref = x + pe_table[:seq][None, :, :]
    assert out.shape == (batch, seq, d_model)
    assert jnp.allclose(out, ref, atol=1e-6, rtol=1e-6)

    print("KERNEL_OK")
</pallas_src>

<mosaic_0001>
module attributes {stable_mosaic.version = 11 : i64} {
  func.func @_pe_add_flat_kernel(%arg0: i32, %arg1: i32, %arg2: memref<2x256xf32, #tpu.memory_space<vmem>>, %arg3: memref<1x256xf32, #tpu.memory_space<vmem>>, %arg4: memref<2x256xf32, #tpu.memory_space<vmem>>) attributes {dimension_semantics = [#tpu.dimension_semantics<parallel>, #tpu.dimension_semantics<parallel>], iteration_bounds = array<i64: 1, 1>, scalar_prefetch = 0 : i64, scratch_operands = 0 : i64, tpu.core_type = #tpu.core_type<tc>, window_params = [{transform_indices = @transform_0, window_bounds = array<i64: 2, 256>}, {transform_indices = @transform_1, window_bounds = array<i64: 1, 256>}, {transform_indices = @transform_2, window_bounds = array<i64: 2, 256>}]} {
    %c0 = arith.constant 0 : index
    %c0_0 = arith.constant 0 : index
    %0 = vector.load %arg2[%c0, %c0_0] : memref<2x256xf32, #tpu.memory_space<vmem>>, vector<2x256xf32>
    %c0_1 = arith.constant 0 : index
    %c0_2 = arith.constant 0 : index
    %1 = vector.load %arg3[%c0_1, %c0_2] : memref<1x256xf32, #tpu.memory_space<vmem>>, vector<1x256xf32>
    %2 = vector.broadcast %1 : vector<1x256xf32> to vector<2x256xf32>
    %3 = arith.addf %0, %2 : vector<2x256xf32>
    %c0_3 = arith.constant 0 : index
    %c0_4 = arith.constant 0 : index
    %4 = vector.load %arg4[%c0_3, %c0_4] : memref<2x256xf32, #tpu.memory_space<vmem>>, vector<2x256xf32>
    tpu.vector_store %arg4[%c0_3, %c0_4], %3 {strides = array<i32>} : memref<2x256xf32, #tpu.memory_space<vmem>>, vector<2x256xf32>,
    return
  }
  func.func @transform_0(%arg0: i32, %arg1: i32) -> (i32, i32) {
    %c0_i32 = arith.constant 0 : i32
    return %arg1, %arg0 : i32, i32
  }
  func.func @transform_1(%arg0: i32, %arg1: i32) -> (i32, i32) {
    %c0_i32 = arith.constant 0 : i32
    %c0_i32_0 = arith.constant 0 : i32
    return %c0_i32, %arg0 : i32, i32
  }
  func.func @transform_2(%arg0: i32, %arg1: i32) -> (i32, i32) {
    %c0_i32 = arith.constant 0 : i32
    return %arg1, %arg0 : i32, i32
  }
}

</mosaic_0001>

<bundles_post_ra>
// kernel: tpu_custom_call.1
= control target key start
LH: loop header
LB: loop body
LE: loop exit
PB: predicated region body
PF: predicated region fallthrough
CT: control target
= control target key end

     0   :  { %7 = vsyncpa [#allocation3], 0  ;;  %s172_s0 = inlined_call_operand.hbm [shape: f32[2,256], index: 0, kind: input, shape index: {}]   ;;  %s173_s1 = inlined_call_operand.hbm [shape: f32[1,256], index: 1, kind: input, shape index: {}]   ;;  %s174_s2 = inlined_call_operand.hbm [shape: f32[2,256], index: 2, kind: output, shape index: {}]  }
   0x1   :  { %8 = vsyncpa [#allocation6], 0 }
   0x2   :  { %9 = vsyncpa [#allocation4], 0  ;;  %s144_s9 = smov [#allocation2]   ;;  %s145_s11 = smov [#allocation5]  }
   0x3   :  { %s16_s10 = sshll.u32 %s144_s9, 4  ;;  %s26_s12 = sshll.u32 %s145_s11, 4  ;;  %s17_s10 = int_to_ptr.vmem [resolvable:$true] %s16_s10  ;;  %s27_s12 = int_to_ptr.vmem [resolvable:$true] %s26_s12 }
   0x4   :  { %s86_s13 = scalar_lea.vmem %s17_s10, 64  ;;  %p91_p1 = scmp.lt.s32.totalorder %s17_s10, %s17_s10 }
   0x5   :  { %p87_p0 = scmp.ne.s32.totalorder %s17_s10, %s86_s13  ;;  %p92_p2 = scmp.lt.s32.totalorder %s86_s13, %s86_s13 }
   0x7   :  { %p93_p3 = por %p92_p2, %p91_p1 }
   0x9   :  { %p94_p4 = pnand %p93_p3, %p87_p0 }
   0xb   :  { %97 = shalt.err (!%p94_p4)
}
   0xc   :  { %19 = dma.hbm_to_vmem [thread:$0]  %s172_s0, 64, %s17_s10, [#allocation3]  }
   0xd   :  { %s106_s16 = scalar_lea.vmem %s27_s12, 32  ;;  %p111_p6 = scmp.lt.s32.totalorder %s27_s12, %s27_s12 }
   0xe   :  { %p107_p5 = scmp.ne.s32.totalorder %s27_s12, %s106_s16  ;;  %p112_p7 = scmp.lt.s32.totalorder %s106_s16, %s106_s16 }
  0x10   :  { %p113_p8 = por %p112_p7, %p111_p6 }
  0x12   :  { %p114_p9 = pnand %p113_p8, %p107_p5 }
  0x14   :  { %117 = shalt.err (!%p114_p9)
}
  0x15   :  { %29 = dma.hbm_to_vmem [thread:$0]  %s173_s1, 32, %s27_s12, [#allocation6]  }
  0x16   :  { %138 = dma.done.wait [#allocation3], 64  }
  0x17   :  { %139 = vsyncadd [#allocation3], 4294967232 }
  0x18   :  { %140 = dma.done.wait [#allocation6], 32  }
  0x19   :  { %141 = vsyncadd [#allocation6], 4294967264  ;;  %v39_v0 = vlaneseq  ;;  %v146_v1 = vmov 1983009808   ;;  %v37_v7 = vld [vmem:[#allocation5] sm:$0x3] }
  0x1a   :  { %v49_v2 = vunpack.c.l.s4 %v146_v1  ;;  %v36_v12 = vld [vmem:[#allocation2] sm:$0xf]  ;;  %s147_s0 = smov [#allocation7]  }
  0x1b   :  { %v40_v3 = vshrl.u32 %v39_v0, 7  ;;  %s64_s19 = sshll.u32 %s147_s0, 4  ;;  %s65_s19 = int_to_ptr.vmem [resolvable:$true] %s64_s19 }
  0x1c   :  { %v50_v6 = vunpack.c.0.s8 %v49_v2  ;;  %s118_s1 = scalar_lea.vmem %s65_s19, 64  ;;  %p123_p11 = scmp.lt.s32.totalorder %s65_s19, %s65_s19 }
  0x1d   :  { %v41_v4 = vsub.s32 0, %v40_v3  ;;  %v45_v5 = vsub.s32 1, %v40_v3  ;;  %p119_p10 = scmp.ne.s32.totalorder %s65_s19, %s118_s1  ;;  %p124_p12 = scmp.lt.s32.totalorder %s118_s1, %s118_s1 }
  0x1e   :  { %v53_v10 = vsub.s32 %v50_v6, %v40_v3 }
  0x1f   :  { %v42_v8 = vrot.slane %v37_v7, %v41_v4  ;;  %v46_v9 = vrot.slane %v37_v7, %v45_v5  ;;  %p125_p13 = por %p124_p12, %p123_p11 }
  0x21   :  { %v47_v11 = vcombine.low %v42_v8, %v46_v9  ;;  %p126_p0 = pnand %p125_p13, %p119_p10 }
  0x23   :  { %v54_v13 = vrot.slane %v47_v11, %v53_v10 }
  0x25   :  { %v56_v14 = vadd.f32 %v54_v13, %v36_v12 }
  0x27   :  { %57 = vst [vmem:[#allocation7] sm:$0xf] %v56_v14 }
  0x28   :  { %129 = shalt.err (!%p126_p0)
}
  0x29   :  { %67 = dma.vmem_to_hbm [thread:$0]  %s65_s19, 64, %s174_s2, [#allocation4]  }
  0x2a   :  { %142 = dma.done.wait [#allocation4], 64  }
  0x2b   :  { %143 = vsyncadd [#allocation4], 4294967232 }
  0x2c   :  { %71 = vsyncpa [#allocation3], 1 }
  0x2d   :  { %72 = vsyncpa [#allocation6], 1 }
  0x2e   :  { %73 = vsyncpa [#allocation4], 1 }

</bundles_post_ra>
